<compile_context>
chip_gen: v6e
topology: v6e:2x2x1
jax: 0.10.0
libtpu: 0.0.40
codegen_flags: <defaults>
</compile_context>

<pallas_src>
import jax
import jax.numpy as jnp
from jax.experimental import pallas as pl
from jax.experimental.pallas import tpu as pltpu


def _make_concat_connection_kernel(nb):
    """Kernel over a (Nb, Cin, T) activation / residual block."""

    def kernel(x_ref, r_ref, wx_ref, wr_ref, o_ref):
        # x_ref, r_ref: (Nb, Cin, T)   NCHW tiles, spatial on the lane axis
        # wx_ref, wr_ref: (Cout, Cin)  weight halves (concat split)
        # o_ref: (Nb, Cout, T)
        wx = wx_ref[...]
        wr = wr_ref[...]
        # Static unroll over the (small) per-step image count: each iteration
        # is a clean 2-D MXU matmul with f32 accumulation.
        for n in range(nb):
            acc = jnp.dot(wx, x_ref[n], preferred_element_type=jnp.float32)
            acc = acc + jnp.dot(wr, r_ref[n], preferred_element_type=jnp.float32)
            o_ref[n] = acc.astype(o_ref.dtype)

    return kernel


def _choose_tiling(N, Cin, Cout, HW, itemsize, target_step_bytes=4 << 20):
    """Pick (Nb, tile_hw, grid) from a VMEM byte budget.

    target_step_bytes ~= bytes of x + r + out moved per grid step (per buffer);
    double-buffered this stays well under the 32 MiB default scoped VMEM and
    far under v7x's 64 MiB physical VMEM.
    """
    bytes_per_col = (2 * Cin + Cout) * itemsize  # x + r + out, one spatial column

    # --- spatial tile (lane axis) ---
    if HW < 128:
        tile_hw = HW                      # full-extent block (any alignment OK)
    else:
        ideal_cols = max(128, (target_step_bytes // bytes_per_col) // 128 * 128)
        tile_hw = min(ideal_cols, (HW // 128) * 128)
    grid_s = pl.cdiv(HW, tile_hw)         # ragged last block -> masked store

    # --- batch blocking for small-HW layers ---
    step_bytes_per_img = bytes_per_col * tile_hw
    nb_cap = max(1, target_step_bytes // max(1, step_bytes_per_img))
    Nb = 1
    for d in range(1, N + 1):             # largest divisor of N within budget
        if N % d == 0 and d <= nb_cap:
            Nb = d
    # Keep total grid trip count >= 2 when possible so v7x's two TensorCores
    # both get work ("parallel" axes shard across cores on v7x).
    while Nb > 1 and (N // Nb) * grid_s < 2:
        nb2 = Nb - 1
        while nb2 > 1 and N % nb2 != 0:
            nb2 -= 1
        Nb = nb2

    grid = (N // Nb, grid_s)
    per_step_bytes = Nb * step_bytes_per_img + 2 * Cout * Cin * itemsize
    return Nb, tile_hw, grid, per_step_bytes


def concat_connection_forward(x_nchw, residual_nchw, weight):
    """ConcatConnection forward.

    x_nchw, residual_nchw: (N, Cin, H, W)
    weight:                (Cout, 2*Cin, 1, 1)   (nn.Conv2d, bias=False)
    returns:               (N, Cout, H, W)
    """
    N, Cin, H, W = x_nchw.shape
    Cout = weight.shape[0]
    HW = H * W
    itemsize = jnp.dtype(x_nchw.dtype).itemsize

    # Merge spatial dims (free reshape, no HBM transpose / pad).
    x2 = x_nchw.reshape(N, Cin, HW)
    r2 = residual_nchw.reshape(N, Cin, HW)

    # Split the 1x1-conv weight along its input-channel axis:
    #   conv(cat([x, r]), W) == Wx @ x + Wr @ r
    wx = weight[:, :Cin, 0, 0]   # (Cout, Cin)
    wr = weight[:, Cin:, 0, 0]   # (Cout, Cin)

    Nb, tile_hw, grid, per_step_bytes = _choose_tiling(N, Cin, Cout, HW, itemsize)

    # Raise scoped VMEM past v5e's 16 MiB default; stay below v7x's 64 MiB.
    vmem_limit_bytes = int(min(56 << 20, max(32 << 20, 3 * per_step_bytes)))

    cost = pl.CostEstimate(
        flops=4 * N * HW * Cin * Cout,                      # two C x C x HW matmuls
        transcendentals=0,
        bytes_accessed=(2 * Cin + Cout) * N * HW * itemsize
        + 2 * Cout * Cin * itemsize,
    )

    out2 = pl.pallas_call(
        _make_concat_connection_kernel(Nb),
        out_shape=jax.ShapeDtypeStruct((N, Cout, HW), x_nchw.dtype),
        grid_spec=pltpu.PrefetchScalarGridSpec(
            num_scalar_prefetch=0,
            grid=grid,
            in_specs=[
                pl.BlockSpec((Nb, Cin, tile_hw), lambda n, s: (n, 0, s)),
                pl.BlockSpec((Nb, Cin, tile_hw), lambda n, s: (n, 0, s)),
                pl.BlockSpec((Cout, Cin), lambda n, s: (0, 0)),
                pl.BlockSpec((Cout, Cin), lambda n, s: (0, 0)),
            ],
            out_specs=pl.BlockSpec((Nb, Cout, tile_hw), lambda n, s: (n, 0, s)),
        ),
        compiler_params=pltpu.CompilerParams(
            dimension_semantics=("parallel", "parallel"),
            vmem_limit_bytes=vmem_limit_bytes,
        ),
        cost_estimate=cost,
    )(x2, r2, wx, wr)

    return out2.reshape(N, Cout, H, W)


def _reference(x_nchw, residual_nchw, weight):
    xc = jnp.concatenate([x_nchw, residual_nchw], axis=1)
    return jax.lax.conv_general_dilated(
        xc, weight, window_strides=(1, 1), padding=((0, 0), (0, 0)),
        dimension_numbers=("NCHW", "OIHW", "NCHW"))


if __name__ == "__main__":
    key = jax.random.PRNGKey(0)
    N, inplanes, H, W = 2, 4, 16, 16

    k_x, k_r, k_w = jax.random.split(key, 3)
    x = jax.random.normal(k_x, (N, inplanes, H, W), dtype=jnp.float32)
    residual = jax.random.normal(k_r, (N, inplanes, H, W), dtype=jnp.float32)
    # nn.Conv2d(2*inplanes, inplanes, kernel_size=1, bias=False) weight.
    weight = 0.1 * jax.random.normal(
        k_w, (inplanes, 2 * inplanes, 1, 1), dtype=jnp.float32)

    out = concat_connection_forward(x, residual, weight)
    out = jax.block_until_ready(out)

    ref = _reference(x, residual, weight)
    assert out.shape == (N, inplanes, H, W), out.shape
    assert jnp.allclose(out, ref, atol=1e-5, rtol=1e-5), \
        float(jnp.max(jnp.abs(out - ref)))

    print("KERNEL_OK")
</pallas_src>

<mosaic_0001>
module attributes {stable_mosaic.version = 11 : i64} {
  func.func @kernel(%arg0: i32, %arg1: i32, %arg2: memref<1x4x256xf32, #tpu.memory_space<vmem>>, %arg3: memref<1x4x256xf32, #tpu.memory_space<vmem>>, %arg4: memref<4x4xf32, #tpu.memory_space<vmem>>, %arg5: memref<4x4xf32, #tpu.memory_space<vmem>>, %arg6: memref<1x4x256xf32, #tpu.memory_space<vmem>>) attributes {dimension_semantics = [#tpu.dimension_semantics<parallel>, #tpu.dimension_semantics<parallel>], iteration_bounds = array<i64: 2, 1>, scalar_prefetch = 0 : i64, scratch_operands = 0 : i64, tpu.core_type = #tpu.core_type<tc>, window_params = [{transform_indices = @transform_0, window_bounds = array<i64: 1, 4, 256>}, {transform_indices = @transform_1, window_bounds = array<i64: 1, 4, 256>}, {pipeline_mode = #tpu.pipeline_mode<synchronous>, transform_indices = @transform_2, window_bounds = array<i64: 4, 4>}, {pipeline_mode = #tpu.pipeline_mode<synchronous>, transform_indices = @transform_3, window_bounds = array<i64: 4, 4>}, {transform_indices = @transform_4, window_bounds = array<i64: 1, 4, 256>}]} {
    %c0 = arith.constant 0 : index
    %c0_0 = arith.constant 0 : index
    %0 = vector.load %arg4[%c0, %c0_0] : memref<4x4xf32, #tpu.memory_space<vmem>>, vector<4x4xf32>
    %c0_1 = arith.constant 0 : index
    %c0_2 = arith.constant 0 : index
    %1 = vector.load %arg5[%c0_1, %c0_2] : memref<4x4xf32, #tpu.memory_space<vmem>>, vector<4x4xf32>
    %c0_3 = arith.constant 0 : index
    %c0_4 = arith.constant 0 : index
    %c0_5 = arith.constant 0 : index
    %2 = vector.load %arg2[%c0_3, %c0_4, %c0_5] : memref<1x4x256xf32, #tpu.memory_space<vmem>>, vector<1x4x256xf32>
    %3 = vector.shape_cast %2 : vector<1x4x256xf32> to vector<4x256xf32>
    %cst = arith.constant dense<0.000000e+00> : vector<4x256xf32>
    %4 = tpu.matmul %0, %3, %cst {dimension_numbers = #tpu.dot_dimension_numbers<[1], [0], [0], [1], [0, 0, 1, 1], [], []>} : vector<4x4xf32>, vector<4x256xf32>, vector<4x256xf32> -> vector<4x256xf32>
    %c0_6 = arith.constant 0 : index
    %c0_7 = arith.constant 0 : index
    %c0_8 = arith.constant 0 : index
    %5 = vector.load %arg3[%c0_6, %c0_7, %c0_8] : memref<1x4x256xf32, #tpu.memory_space<vmem>>, vector<1x4x256xf32>
    %6 = vector.shape_cast %5 : vector<1x4x256xf32> to vector<4x256xf32>
    %cst_9 = arith.constant dense<0.000000e+00> : vector<4x256xf32>
    %7 = tpu.matmul %1, %6, %cst_9 {dimension_numbers = #tpu.dot_dimension_numbers<[1], [0], [0], [1], [0, 0, 1, 1], [], []>} : vector<4x4xf32>, vector<4x256xf32>, vector<4x256xf32> -> vector<4x256xf32>
    %8 = arith.addf %4, %7 : vector<4x256xf32>
    %c0_10 = arith.constant 0 : index
    %c0_11 = arith.constant 0 : index
    %c0_12 = arith.constant 0 : index
    %9 = vector.load %arg6[%c0_10, %c0_11, %c0_12] : memref<1x4x256xf32, #tpu.memory_space<vmem>>, vector<1x4x256xf32>
    %10 = vector.shape_cast %9 : vector<1x4x256xf32> to vector<4x256xf32>
    %11 = vector.shape_cast %8 : vector<4x256xf32> to vector<1x4x256xf32>
    tpu.vector_store %arg6[%c0_10, %c0_11, %c0_12], %11 {strides = array<i32>} : memref<1x4x256xf32, #tpu.memory_space<vmem>>, vector<1x4x256xf32>,
    return
  }
  func.func @transform_0(%arg0: i32, %arg1: i32) -> (i32, i32, i32) {
    %c0_i32 = arith.constant 0 : i32
    %c0_i32_0 = arith.constant 0 : i32
    return %arg0, %c0_i32, %arg1 : i32, i32, i32
  }
  func.func @transform_1(%arg0: i32, %arg1: i32) -> (i32, i32, i32) {
    %c0_i32 = arith.constant 0 : i32
    %c0_i32_0 = arith.constant 0 : i32
    return %arg0, %c0_i32, %arg1 : i32, i32, i32
  }
  func.func @transform_2(%arg0: i32, %arg1: i32) -> (i32, i32) {
    %c0_i32 = arith.constant 0 : i32
    %c0_i32_0 = arith.constant 0 : i32
    %c0_i32_1 = arith.constant 0 : i32
    return %c0_i32, %c0_i32_0 : i32, i32
  }
  func.func @transform_3(%arg0: i32, %arg1: i32) -> (i32, i32) {
    %c0_i32 = arith.constant 0 : i32
    %c0_i32_0 = arith.constant 0 : i32
    %c0_i32_1 = arith.constant 0 : i32
    return %c0_i32, %c0_i32_0 : i32, i32
  }
  func.func @transform_4(%arg0: i32, %arg1: i32) -> (i32, i32, i32) {
    %c0_i32 = arith.constant 0 : i32
    %c0_i32_0 = arith.constant 0 : i32
    return %arg0, %c0_i32, %arg1 : i32, i32, i32
  }
}

</mosaic_0001>

<bundles_post_ra>
// kernel: tpu_custom_call.1
= control target key start
LH: loop header
LB: loop body
LE: loop exit
PB: predicated region body
PF: predicated region fallthrough
CT: control target
= control target key end

     0   :  { %s1094_s0 = inlined_call_operand.hbm [shape: f32[2,4,256], index: 0, kind: input, shape index: {}]   ;;  %s1095_s1 = inlined_call_operand.hbm [shape: f32[2,4,256], index: 1, kind: input, shape index: {}]   ;;  %s1096_s2 = inlined_call_operand.hbm [shape: f32[4,4], index: 2, kind: input, shape index: {}]   ;;  %s1097_s3 = inlined_call_operand.vmem [shape: f32[4,4], index: 3, kind: input, shape index: {}]   ;;  %s1098_s4 = inlined_call_operand.hbm [shape: f32[2,4,256], index: 4, kind: output, shape index: {}]  }
   0x1   :  { %1099 = sst [smem:[#allocation13_spill]] %s1094_s0 }
   0x2   :  { %1100 = sst [smem:[#allocation14_spill]] %s1096_s2 }
   0x3   :  { %9 = vsyncpa [#allocation3], 0 }
   0x4   :  { %11 = vsyncpa [#allocation3 + $0x1], 0 }
   0x5   :  { %12 = vsyncpa [#allocation6], 0 }
   0x6   :  { %14 = vsyncpa [#allocation6 + $0x1], 0 }
   0x7   :  { %15 = vsyncpa [#allocation4], 0 }
   0x8   :  { %17 = vsyncpa [#allocation4 + $0x1], 0  ;;  %s909_s15 = smov 0   ;;  %s911_s16 = smov 0  }
   0x9   :  { %s913_s17 = smov 0   ;;  %s915_s18 = smov 0  }
   0xa   :  { %s917_s19 = smov 0   ;;  %s919_s20 = smov 0  }
   0xb LB: > { %s940_s21 = sadd.s32 4294967295, %s877_s20   ;;  %s597_s22 = sadd.s32 4294967294, %s877_s20   ;;  %s877_s20 = sphi %s919_s20, %s23_s20   ;;  %s873_s19 = sphi %s917_s19, %s1116_s19   ;;  %s869_s18 = sphi %s915_s18, %s1115_s18   ;;  %s865_s17 = sphi %s913_s17, %s1114_s17   ;;  %s861_s16 = sphi %s911_s16, %s1113_s16   ;;  %s857_s15 = sphi %s909_s15, %s1112_s15  }
   0xc   : > { %p57_p0 = scmp.ne.s32.totalorder %s861_s16, %s857_s15  ;;  %p58_p1 = scmp.eq.s32.totalorder %s940_s21, 0 }
   0xd   : > { %p159_p3 = scmp.eq.s32.totalorder %s597_s22, 1  ;;  %p598_p5 = scmp.ge.s32.totalorder %s877_s20, 1 }
   0xe   : > { %p949_p4 = por %p58_p1, %p57_p0  ;;  %p166_p7 = scmp.lt.s32.totalorder %s877_s20, 3 }
   0xf   : > { %p954_p6 = por %p159_p3, %p57_p0  ;;  %s879_s26 = smov [#allocation7]  }
  0x10   : > { %p959_p8 = pnand %p598_p5, %p166_p7  ;;  %s179_s27 = sshll.u32 %s879_s26, 4  ;;  %s180_s27 = int_to_ptr.vmem [resolvable:$true] %s179_s27 }
  0x11   : > { %s1102_s24 = scalar_select %p954_p6, 1, 0 }
  0x12   : > { %p636_p10 = pneg %p959_p8  ;;  %s35_s29 = sadd.s32 1, %s873_s19 }
  0x13   : > { %s44_s30 = sadd.s32 1, %s865_s17  ;;  %p37_p12 = scmp.ge.s32.totalorder %s35_s29, 2 }
  0x14   : > { %p968_p11 = pnand %p636_p10, %p58_p1  ;;  %s718_s5 = scalar_lea.vmem %s180_s27, 64 }
  0x15   : > { %p719_p0 = scmp.ne.s32.totalorder %s180_s27, %s718_s5  ;;  %p726_p7 = scmp.lt.s32.totalorder %s180_s27, %s180_s27 }
  0x16   : > { %p709_p13 = pneg %p968_p11  ;;  %p727_p2 = scmp.lt.s32.totalorder %s718_s5, %s718_s5 }
  0x18   : > { %p721_p3 = pnand %p719_p0, %p709_p13  ;;  %p728_p9 = por %p727_p2, %p726_p7 }
  0x1a   : > { %p722_p5 = pneg %p721_p3 }
  0x1c   : > { %p729_p6 = pnand %p728_p9, %p722_p5 }
  0x1e   : > { %732 = shalt.err (!%p729_p6)
}
  0x1f   : > { %s1105_s2 = sld [smem:[#allocation14_spill]]  ;;  %s1118_s29 = smov (%p37_p12, %s35_s29), 0 }
  0x20   : > { %p51_p2 = scmp.ne.s32.totalorder %s865_s17, %s861_s16  ;;  %p52_p6 = scmp.eq.s32.totalorder %s877_s20, 0 }
  0x21   : > { %s39_s8 = ssub.s32 %s873_s19, %s1118_s29  ;;  %p652_p9 = scmp.lt.s32.totalorder %s877_s20, 2 }
  0x22   : > { %p42_p10 = scmp.eq.s32.totalorder %s39_s8, 0  ;;  %p53_p13 = por %p52_p6, %p51_p2 }
  0x23   : > { %p1106_p0 = scmp.eq.s32.totalorder %s940_s21, 1  ;;  %s193_s10 = sand.u32 1, %s865_s17  }
  0x24   : > { %s997_s11 = scalar_select %p42_p10, %s865_s17, %s44_s30  }
  0x25   : > { %639 = dma.hbm_to_vmem [thread:$0]  (!%p968_p11), %s1105_s2, 64, %s180_s27, [#allocation6]  }
  0x26   : > { %p991_p3 = por %p1106_p0, %p51_p2  ;;  %s601_s12 = sshll.u32 %s193_s10, 3 }
  0x27   : > { %s623_s13 = sshll.u32 %s873_s19, 7  ;;  %s1108_s0 = sld [smem:[#allocation13_spill]] }
  0x28   : > { %s197_s27 = scalar_lea.vmem [#allocation2], %s601_s12  ;;  %p1003_p11 = pnand %p652_p9, %p53_p13 }
  0x29   : > { %s207_s28 = sshll.u32 %s197_s27, 4  ;;  %s1010_s30 = scalar_lea.hbm %s1095_s1, %s623_s13  ;;  %s208_s28 = int_to_ptr.vmem [resolvable:$true] %s207_s28 }
  0x2a   : > { %s214_s8 = sand.u32 1, %s877_s20   ;;  %s194_s2 = scalar_lea.sflag [#allocation3], %s193_s10 }
  0x2b   : > { %p735_p12 = pneg %p1003_p11  ;;  %s746_s14 = scalar_lea.vmem %s208_s28, 128 }
  0x2c   : > { %p747_p5 = scmp.ne.s32.totalorder %s208_s28, %s746_s14  ;;  %s880_s22 = smov [#allocation2]  }
  0x2d   : > { %s205_s26 = scalar_lea.hbm %s1108_s0, %s623_s13  ;;  %s751_s27 = sshll.u32 %s880_s22, 4  ;;  %s752_s27 = int_to_ptr.vmem [resolvable:$false] %s751_s27 }
  0x2e   : > { %p749_p7 = pnand %p747_p5, %p735_p12  ;;  %s753_s0 = scalar_lea.vmem %s752_s27, 256 }
  0x2f   : > { %p754_p6 = scmp.lt.s32.totalorder %s208_s28, %s752_s27  ;;  %p755_p9 = scmp.lt.s32.totalorder %s753_s0, %s746_s14 }
  0x30   : > { %p750_p2 = pneg %p749_p7 }
  0x31   : > { %p756_p10 = por %p755_p9, %p754_p6 }
  0x33   : > { %p757_p13 = pnand %p756_p10, %p750_p2 }
  0x35   : > { %760 = shalt.err (!%p757_p13)
}
  0x36   : > { %643 = dma.hbm_to_vmem [thread:$0]  (!%p1003_p11), %s205_s26, 128, %s208_s28, %s194_s2  }
  0x37   : > { %s218_s10 = scalar_lea.vmem [#allocation5], %s601_s12  ;;  %s215_s6 = scalar_lea.sflag [#allocation6], %s214_s8 }
  0x38   : > { %s228_s13 = sshll.u32 %s218_s10, 4  ;;  %s881_s22 = smov [#allocation5]   ;;  %s229_s13 = int_to_ptr.vmem [resolvable:$true] %s228_s13 }
  0x39   : > { %s774_s7 = scalar_lea.vmem %s229_s13, 128  ;;  %s779_s27 = sshll.u32 %s881_s22, 4  ;;  %s780_s27 = int_to_ptr.vmem [resolvable:$false] %s779_s27 }
  0x3a   : > { %p775_p0 = scmp.ne.s32.totalorder %s229_s13, %s774_s7  ;;  %s781_s0 = scalar_lea.vmem %s780_s27, 256 }
  0x3b   : > { %p782_p2 = scmp.lt.s32.totalorder %s229_s13, %s780_s27  ;;  %p783_p6 = scmp.lt.s32.totalorder %s781_s0, %s774_s7 }
  0x3c   : > { %p777_p5 = pnand %p775_p0, %p735_p12 }
  0x3d   : > { %p784_p9 = por %p783_p6, %p782_p2 }
  0x3e   : > { %p778_p7 = pneg %p777_p5 }
  0x40   : > { %p785_p10 = pnand %p784_p9, %p778_p7 }
  0x42   : > { %788 = shalt.err (!%p785_p10)
}
  0x43   : > { %646 = dma.hbm_to_vmem [thread:$0]  (!%p1003_p11), %s1010_s30, 128, %s229_s13, %s215_s6  }
  0x44   : > { %237 = sbr.rel (%p959_p8) target bundleno = 296 (0x128), region = 36  ;;  %s1029_s2 = sand.u32 (!%p959_p8), 1, %s861_s16  }
  0x45   : > { %s1032_s12 = sshll.u32 (!%p959_p8), %s1029_s2, 3  ;;  %s240_s26 = scalar_lea.sflag (!%p959_p8), [#allocation3], %s1029_s2 }
  0x46   : > { %s243_s28 = scalar_lea.vmem (!%p959_p8), [#allocation2], %s1032_s12 }
  0x49   : > { %840 = dma.done.wait (%p949_p4), %s240_s26, 128  }
  0x4a   : > { %842 = vsyncadd (%p949_p4), %s240_s26, 4294967168  ;;  %s248_s25 = sand.u32 1, %s940_s21   ;;  %s252_s30 = scalar_lea.vmem [#allocation5], %s1032_s12 }
  0x4b   : > { %s249_s5 = scalar_lea.sflag [#allocation6], %s248_s25 }
  0x4c   : > { %844 = dma.done.wait (%p949_p4), %s249_s5, 128  }
  0x4d   : > { %846 = vsyncadd (%p949_p4), %s249_s5, 4294967168 }
  0x4e   : > { %848 = dma.done.wait (%p58_p1), [#allocation6], 64  }
  0x4f   : > { %850 = vsyncadd (%p58_p1), [#allocation6], 4294967232  ;;  %v882_v0 = vmov 0.0   ;;  %v292_v1 = vld [vmem:[%s252_s30] sm:$0xff]  ;;  %vm299_vm0 = vcmask 1043456   ;;  %v291_v2 = vld [vmem:[%s243_s28] sm:$0xff] }
  0x50   : > { %368 = vmatprep.mubr.f32.mxu0 %v882_v0  ;;  %448 = vmatprep.mubr.f32.mxu1 %v882_v0  ;;  %v294_v3 = vcombine.high %v292_v1, %v292_v1  ;;  %v376_v4 = vcombine.high %v291_v2, %v291_v2  ;;  %v290_v5 = vld [vmem:[%s1097_s3] sm:$0xf]  ;;  %vm295_vm1 = vcmask 31744   ;;  %s625_s21 = sshll.u32 %s869_s18, 7  ;;  %s285_s23 = scalar_lea.vmem [#allocation8], %s1032_s12 }
  0x51   : > { %v289_v6 = vld [vmem:[#allocation7] sm:$0xf]  ;;  %s477_s10 = sshll.u32 %s285_s23, 4  ;;  %s475_s7 = scalar_lea.hbm %s1098_s4, %s625_s21  ;;  %s478_s10 = int_to_ptr.vmem [resolvable:$true] %s477_s10 }
  0x52   : > { %612 = vmatprep.subr.msk.mxu0 %vm299_vm0, %v294_v3  ;;  %615 = vmatprep.subr.msk.mxu1 %vm299_vm0, %v376_v4  ;;  %s461_s22 = scalar_lea.sflag [#allocation4], %s1029_s2  ;;  %s789_s27 = scalar_lea.vmem %s478_s10, 128 }
  0x53   : > { %613 = vmatpush1.msk.msra.mxu0 %vm299_vm0, %v292_v1  ;;  %616 = vmatpush1.msk.msra.mxu1 %vm299_vm0, %v291_v2  ;;  %p790_p1 = scmp.ne.s32.totalorder %s478_s10, %s789_s27  ;;  %s883_s0 = smov [#allocation8]  }
  0x54   : > { %614 = vmatmul.mubr.msk.f32.vlgmr.msra.gmra.mxu0 %vm295_vm1, %v290_v5  ;;  %617 = vmatmul.mubr.msk.f32.vlgmr.msra.gmra.mxu1 %vm295_vm1, %v289_v6  ;;  %s793_s26 = sshll.u32 %s883_s0, 4  ;;  %s794_s26 = int_to_ptr.vmem [resolvable:$false] %s793_s26 }
  0x55   : > { %p791_p4 = pnand %p790_p1, %p991_p3  ;;  %s795_s18 = scalar_lea.vmem %s794_s26, 256 }
  0x56   : > { %p796_p11 = scmp.lt.s32.totalorder %s478_s10, %s794_s26  ;;  %p797_p12 = scmp.lt.s32.totalorder %s795_s18, %s789_s27 }
  0x57   : > { %p792_p8 = pneg %p791_p4 }
  0x58   : > { %p798_p13 = por %p797_p12, %p796_p11 }
  0x5a   : > { %p799_p0 = pnand %p798_p13, %p792_p8 }
 0x114   : > { %v370_v7 = vpop.f32.mrf.mxu0  ;;  %v450_v8 = vpop.f32.mrf.mxu1 }
 0x115   : > { %v451_v11 = vadd.f32 %v450_v8, %v370_v7 }
 0x116   : > { %v372_v9 = vpop.f32.mrf.mxu0  ;;  %v452_v10 = vpop.f32.mrf.mxu1 }
 0x117   : > { %v453_v12 = vadd.f32 %v452_v10, %v372_v9 }
 0x119   : > { %v457_v13 = vcombine.low %v451_v11, %v453_v12 }
 0x11b   : > { %459 = vst [vmem:[%s285_s23] sm:$0xff] %v457_v13 }
 0x11c   : > { %802 = shalt.err (!%p799_p0)
}
 0x11d   : > { %s803_s12 = scalar_lea.hbm %s475_s7, 128  ;;  %s807_s25 = scalar_lea.hbm %s1098_s4, 256 }
 0x11e   : > { %p804_p5 = scmp.ne.s32.totalorder %s475_s7, %s803_s12  ;;  %p808_p6 = scmp.lt.s32.totalorder %s475_s7, %s1098_s4 }
 0x11f   : > { %p809_p9 = scmp.lt.s32.totalorder %s807_s25, %s803_s12 }
 0x120   : > { %p805_p7 = pnand %p804_p5, %p991_p3 }
 0x121   : > { %p810_p10 = por %p809_p9, %p808_p6 }
 0x122   : > { %p806_p2 = pneg %p805_p7 }
 0x124   : > { %p811_p1 = pnand %p810_p10, %p806_p2 }
 0x126   : > { %814 = shalt.err (!%p811_p1)
}
 0x127   : > { %634 = dma.vmem_to_hbm [thread:$0]  (%p991_p3), %s478_s10, 128, %s475_s7, %s461_s22  }
 0x128 PF: > { %s489_s8 = sand.u32 1, %s857_s15   ;;  %p1110_p4 = scmp.ne.s32.totalorder %s1102_s24, 0 }
 0x129   : > { %p1111_p8 = scmp.ge.s32.totalorder %s877_s20, 2  ;;  %s490_s14 = scalar_lea.sflag [#allocation4], %s489_s8 }
 0x12b   : > { %p648_p11 = pnand %p1111_p8, %p1110_p4 }
 0x12d   : > { %p649_p12 = pneg %p648_p11 }
 0x12f   : > { %852 = dma.done.wait (%p649_p12), %s490_s14, 128  }
 0x130   : > { %854 = vsyncadd (%p649_p12), %s490_s14, 4294967168  ;;  %s23_s20 = sadd.s32 1, %s877_s20   ;;  %s1112_s15 = smov %s861_s16 }
 0x131   : > { %p20_p13 = scmp.ge.s32.totalorder %s23_s20, 4   ;;  %s1113_s16 = smov %s865_s17 }
 0x132   : > { %s1114_s17 = smov %s997_s11  ;;  %s1115_s18 = smov %s873_s19 }
 0x133   : > { %s1116_s19 = smov %s1118_s29  ;;  %22 = sbr.rel (!%p20_p13) target bundleno = 11 (0xb), region = 98 }
 0x138   :  { %495 = vsyncpa [#allocation3], 1 }
 0x139   :  { %497 = vsyncpa [#allocation3 + $0x1], 1 }
 0x13a   :  { %498 = vsyncpa [#allocation6], 1 }
 0x13b   :  { %500 = vsyncpa [#allocation6 + $0x1], 1 }
 0x13c   :  { %501 = vsyncpa [#allocation4], 1 }
 0x13d   :  { %503 = vsyncpa [#allocation4 + $0x1], 1 }

</bundles_post_ra>
